<compile_context>
chip_gen: v6e
topology: v6e:2x2x1
jax: 0.10.0
libtpu: 0.0.40
codegen_flags: <defaults>
</compile_context>

<pallas_src>
import jax
import jax.numpy as jnp
from jax.experimental import pallas as pl
from jax.experimental.pallas import tpu as pltpu

_LANE = 128  # hidden width of the output heads (hard-wired 128 in the module)


def _round_up(x, m):
    return (x + m - 1) // m * m


def _choose_tile_bn(bn):
    """MXU / megacore aware row-tile pick (bn is a static Python int)."""
    if bn <= 128:
        return _round_up(bn, 8)                 # tiny: one exact tile, minimal padding
    if bn <= 256:
        return _round_up((bn + 1) // 2, 8)      # 2 grid steps so v7x's 2nd TC gets work
    for t in (1024, 512, 256, 128):             # largest MXU-friendly tile with >=2
        padded = _round_up(bn, t)               # steps and <=25% padding waste
        if padded // t >= 2 and (padded - bn) * 4 <= padded:
            return t
    return 128


# ----------------------------- Pallas kernel -----------------------------

def _fused_forward_kernel(x_ref, win_ref, bin_ref, w1_ref, b1_ref, w2f_ref, b2_ref, o_ref):
    """Fused STSGCN forward for one tile of B*N locations.

    x   : (tile, T*Cin)  bf16   per-location input, t-major / c-minor
    win : (T*Cin, T*nhid) bf16  kron(I_T, w_in) -> input 1x1 conv for all T steps
    bin : (1, T*nhid)    f32    b_in tiled T times
    w1  : (T*nhid, P*128) bf16  fully_1 weights of all P heads, lane-dense
    b1  : (1, P*128)     f32
    w2f : (1, P*128)     f32    flat fully_2 weights (head p in lanes p*128:(p+1)*128)
    b2  : (1, 128)       f32    first P lanes hold the fully_2 biases
    o   : (tile, 128)    f32    lane-dense output; first P lanes are the predictions
    """
    # input_layer (1x1 conv, block-diagonal over time) + relu; f32 accumulation.
    z = jnp.dot(x_ref[...], win_ref[...], preferred_element_type=jnp.float32)
    z = jnp.maximum(z + bin_ref[...], 0.0)
    # fully_1 of all P heads in one lane-dense bf16 MXU matmul (+bias, relu) in f32.
    h = jnp.dot(z.astype(jnp.bfloat16), w1_ref[...], preferred_element_type=jnp.float32)
    h = jnp.maximum(h + b1_ref[...], 0.0)
    # fully_2 (128 -> 1 per head) off the MXU: VPU elementwise multiply + per-head
    # XLU lane reductions, accumulated into the lane-dense (tile, 128) output.
    tmp = h * w2f_ref[...]
    tile, out_w = o_ref.shape
    n_heads = w1_ref.shape[1] // _LANE
    lane = jax.lax.broadcasted_iota(jnp.int32, (tile, out_w), 1)
    o = jnp.broadcast_to(b2_ref[...], (tile, out_w))
    for p in range(n_heads):  # P is small & static
        s_p = jnp.sum(tmp[:, p * _LANE:(p + 1) * _LANE], axis=-1, keepdims=True)
        o = jnp.where(lane == p, o + s_p, o)
    o_ref[...] = o  # unmasked 128-lane store


# ------------------------------ pallas_call wrapper ------------------------------

def _fused_forward(x_bn, w_in_blk, b_in_t, w1_all, b1_all, w2_flat, b2_pad, *, tile_bn):
    BNp, TC = x_bn.shape
    TF = w_in_blk.shape[1]
    PH = w1_all.shape[1]
    OUT = _LANE
    grid = (BNp // tile_bn,)

    # VMEM budget: only the gridded x / out blocks are double-buffered; resident
    # weights (constant index_map) and in-kernel intermediates count once.
    blk = 2 * (2 * tile_bn * TC + 4 * tile_bn * OUT)                # bf16 in, f32 out, x2
    resident = 2 * TC * TF + 4 * TF + 2 * TF * PH + 4 * PH + 4 * PH + 4 * OUT
    interm = 4 * tile_bn * (TF + 2 * PH + OUT)                       # z, h, tmp, o (f32)
    vmem_limit = int(min(max(blk + resident + interm + (2 << 20), 8 << 20), 32 << 20))

    return pl.pallas_call(
        _fused_forward_kernel,
        out_shape=jax.ShapeDtypeStruct((BNp, OUT), jnp.float32),
        grid=grid,
        in_specs=[
            pl.BlockSpec((tile_bn, TC), lambda i: (i, 0)),
            pl.BlockSpec((TC, TF), lambda i: (0, 0)),
            pl.BlockSpec((1, TF), lambda i: (0, 0)),
            pl.BlockSpec((TF, PH), lambda i: (0, 0)),
            pl.BlockSpec((1, PH), lambda i: (0, 0)),
            pl.BlockSpec((1, PH), lambda i: (0, 0)),
            pl.BlockSpec((1, OUT), lambda i: (0, 0)),
        ],
        out_specs=pl.BlockSpec((tile_bn, OUT), lambda i: (i, 0)),
        compiler_params=pltpu.CompilerParams(
            dimension_semantics=("parallel",),
            vmem_limit_bytes=vmem_limit,
        ),
    )(x_bn, w_in_blk, b_in_t, w1_all, b1_all, w2_flat, b2_pad)


# ------------------------------ weight packing (one-time) ------------------------------

def pack_params(params):
    """One-time repack of module weights into fused, lane-dense MXU operands.

    Do NOT call this inside the per-step forward: it is meant to run once at
    init so no kron / reshape / scatter executes per call.
    """
    _, nhid = params["w_in"].shape
    P, TF, H = params["w1t"].shape
    assert H == _LANE
    T = TF // nhid
    # input 1x1 conv applied independently per time step == block-diagonal matmul.
    w_in_blk = jnp.kron(jnp.eye(T, dtype=jnp.float32), params["w_in"]).astype(jnp.bfloat16)
    b_in_t = jnp.tile(params["b_in"], (1, T)).astype(jnp.float32)        # (1, T*nhid)
    # all P fully_1 heads side by side on the lane axis.
    w1_all = jnp.transpose(params["w1t"], (1, 0, 2)).reshape(TF, P * H).astype(jnp.bfloat16)
    b1_all = params["b1"].reshape(1, P * H).astype(jnp.float32)
    # fully_2 weights flat on the lane axis (head p occupies lanes p*128:(p+1)*128).
    w2_flat = params["w2"].reshape(1, P * H).astype(jnp.float32)
    b2_pad = jnp.zeros((1, _LANE), jnp.float32).at[0, :P].set(params["b2"][0])
    return {"w_in_blk": w_in_blk, "b_in_t": b_in_t, "w1_all": w1_all,
            "b1_all": b1_all, "w2_flat": w2_flat, "b2_pad": b2_pad}


# ------------------------------ full forward ------------------------------

@jax.jit
def stsgcn_forward(x, packed):
    """x: (B, seq_length, num_nodes, in_dim) f32 -> (B, predict_length, num_nodes, 1)."""
    B, T, N, Cin = x.shape
    TF = packed["w_in_blk"].shape[1]
    PH = packed["w1_all"].shape[1]
    P = PH // _LANE
    assert packed["w_in_blk"].shape[0] == T * Cin

    BN = B * N
    tile_bn = _choose_tile_bn(BN)
    BN_pad = _round_up(BN, tile_bn)

    # (B,T,N,C) -> (B,N,T,C) -> (BN, T*C): each location's full time history on one
    # row (t-major, c-minor).  Tiny wrapper-side regroup; cast to bf16 for the MXU.
    x_bn = jnp.transpose(x, (0, 2, 1, 3)).reshape(BN, T * Cin)
    if BN_pad != BN:
        # Padded rows produce garbage that is sliced off below (never aliased/accumulated).
        x_bn = jnp.pad(x_bn, ((0, BN_pad - BN), (0, 0)))
    x_bn = x_bn.astype(jnp.bfloat16)

    # TODO(synk): stsgcl layers (class not provided) -> layer_num = 0; adj = mask * A unused.

    out_pad = _fused_forward(x_bn, packed["w_in_blk"], packed["b_in_t"],
                             packed["w1_all"], packed["b1_all"],
                             packed["w2_flat"], packed["b2_pad"],
                             tile_bn=tile_bn)                             # (BN_pad, 128)
    out = out_pad[:BN, :P].reshape(B, N, P)
    return jnp.transpose(out, (0, 2, 1))[..., None]                       # (B, P, N, 1)


def reference_forward(x, params):
    """Pure-JAX f32 reference mirroring the PyTorch module (layer_num = 0)."""
    B, T, N, Cin = x.shape
    nhid = params["w_in"].shape[1]
    P = params["w1t"].shape[0]
    h = jnp.maximum(jnp.einsum("btnc,ch->btnh", x, params["w_in"]) + params["b_in"][0], 0.0)
    z = jnp.transpose(h, (0, 2, 1, 3)).reshape(B, N, T * nhid)
    outs = []
    for p in range(P):
        hp = jnp.maximum(jnp.einsum("bnf,fk->bnk", z, params["w1t"][p]) + params["b1"][p], 0.0)
        op = jnp.einsum("bnk,k->bn", hp, params["w2"][p, 0]) + params["b2"][0, p]
        outs.append(op)
    return jnp.stack(outs, axis=1)[..., None]  # (B, P, N, 1)


# ------------------------------ params / main ------------------------------

def init_params(key, *, in_dim, nhid, num_nodes, seq_length, predict_length):
    ks = jax.random.split(key, 8)
    TF = seq_length * nhid
    hidden = _LANE
    return {
        # input_layer Conv2d(in_dim, nhid, 1x1): weight stored transposed (in_dim, nhid)
        "w_in": 0.1 * jax.random.normal(ks[0], (in_dim, nhid), jnp.float32),
        "b_in": 0.1 * jax.random.normal(ks[1], (1, nhid), jnp.float32),
        # mask parameter (3N, 3N) and adjacency A (3N, 3N); unused while layer_num = 0
        "mask": jax.random.uniform(ks[2], (3 * num_nodes, 3 * num_nodes), jnp.float32),
        "A": jax.random.uniform(ks[3], (3 * num_nodes, 3 * num_nodes), jnp.float32),
        # output_layer heads: fully_1 Conv2d(T*nhid, 128, 1x1) stored transposed (P, T*nhid, 128)
        "w1t": 0.05 * jax.random.normal(ks[4], (predict_length, TF, hidden), jnp.float32),
        "b1": 0.05 * jax.random.normal(ks[5], (predict_length, hidden), jnp.float32),
        # fully_2 Conv2d(128, 1, 1x1) -> (P, 1, 128) and bias (1, P)
        "w2": 0.05 * jax.random.normal(ks[6], (predict_length, 1, hidden), jnp.float32),
        "b2": 0.05 * jax.random.normal(ks[7], (1, predict_length), jnp.float32),
    }


if __name__ == "__main__":
    # small, module-consistent shapes
    B, seq_length, num_nodes, in_dim = 2, 8, 16, 3
    nhid, predict_length = 32, 4
    # layer_num = 0  (stsgcl class not provided -> loop is a no-op)

    key = jax.random.PRNGKey(0)
    kx, kp = jax.random.split(key)
    x = jax.random.normal(kx, (B, seq_length, num_nodes, in_dim), jnp.float32)
    params = init_params(kp, in_dim=in_dim, nhid=nhid, num_nodes=num_nodes,
                         seq_length=seq_length, predict_length=predict_length)

    # One-time weight repack (hoisted out of the per-call jitted forward).
    packed = jax.tree_util.tree_map(jax.block_until_ready, pack_params(params))

    out = jax.block_until_ready(stsgcn_forward(x, packed))
    ref = jax.block_until_ready(reference_forward(x, params))

    assert out.shape == (B, predict_length, num_nodes, 1), out.shape
    # bf16 matmul operands with f32 accumulation -> relaxed tolerance.
    assert jnp.allclose(out, ref, rtol=1e-2, atol=1e-2), float(jnp.max(jnp.abs(out - ref)))
    print("KERNEL_OK")
</pallas_src>

<mosaic_0001>
module attributes {stable_mosaic.version = 11 : i64} {
  func.func @_fused_forward_kernel(%arg0: i32, %arg1: memref<32x24xbf16, #tpu.memory_space<vmem>>, %arg2: memref<24x256xbf16, #tpu.memory_space<vmem>>, %arg3: memref<1x256xf32, #tpu.memory_space<vmem>>, %arg4: memref<256x512xbf16, #tpu.memory_space<vmem>>, %arg5: memref<1x512xf32, #tpu.memory_space<vmem>>, %arg6: memref<1x512xf32, #tpu.memory_space<vmem>>, %arg7: memref<1x128xf32, #tpu.memory_space<vmem>>, %arg8: memref<32x128xf32, #tpu.memory_space<vmem>>) attributes {dimension_semantics = [#tpu.dimension_semantics<parallel>], iteration_bounds = array<i64: 1>, scalar_prefetch = 0 : i64, scratch_operands = 0 : i64, tpu.core_type = #tpu.core_type<tc>, window_params = [{transform_indices = @transform_0, window_bounds = array<i64: 32, 24>}, {pipeline_mode = #tpu.pipeline_mode<synchronous>, transform_indices = @transform_1, window_bounds = array<i64: 24, 256>}, {pipeline_mode = #tpu.pipeline_mode<synchronous>, transform_indices = @transform_2, window_bounds = array<i64: 1, 256>}, {pipeline_mode = #tpu.pipeline_mode<synchronous>, transform_indices = @transform_3, window_bounds = array<i64: 256, 512>}, {pipeline_mode = #tpu.pipeline_mode<synchronous>, transform_indices = @transform_4, window_bounds = array<i64: 1, 512>}, {pipeline_mode = #tpu.pipeline_mode<synchronous>, transform_indices = @transform_5, window_bounds = array<i64: 1, 512>}, {pipeline_mode = #tpu.pipeline_mode<synchronous>, transform_indices = @transform_6, window_bounds = array<i64: 1, 128>}, {transform_indices = @transform_7, window_bounds = array<i64: 32, 128>}]} {
    %c0 = arith.constant 0 : index
    %c0_0 = arith.constant 0 : index
    %0 = vector.load %arg1[%c0, %c0_0] : memref<32x24xbf16, #tpu.memory_space<vmem>>, vector<32x24xbf16>
    %c0_1 = arith.constant 0 : index
    %c0_2 = arith.constant 0 : index
    %1 = vector.load %arg2[%c0_1, %c0_2] : memref<24x256xbf16, #tpu.memory_space<vmem>>, vector<24x256xbf16>
    %cst = arith.constant dense<0.000000e+00> : vector<32x256xf32>
    %2 = tpu.matmul %0, %1, %cst {dimension_numbers = #tpu.dot_dimension_numbers<[1], [0], [0], [1], [0, 0, 1, 1], [], []>} : vector<32x24xbf16>, vector<24x256xbf16>, vector<32x256xf32> -> vector<32x256xf32>
    %c0_3 = arith.constant 0 : index
    %c0_4 = arith.constant 0 : index
    %3 = vector.load %arg3[%c0_3, %c0_4] : memref<1x256xf32, #tpu.memory_space<vmem>>, vector<1x256xf32>
    %4 = vector.broadcast %3 : vector<1x256xf32> to vector<32x256xf32>
    %5 = arith.addf %2, %4 : vector<32x256xf32>
    %cst_5 = arith.constant 0.000000e+00 : f32
    %6 = vector.broadcast %cst_5 : f32 to vector<32x256xf32>
    %7 = arith.maximumf %5, %6 : vector<32x256xf32>
    %8 = arith.truncf %7 : vector<32x256xf32> to vector<32x256xbf16>
    %c0_6 = arith.constant 0 : index
    %c0_7 = arith.constant 0 : index
    %9 = vector.load %arg4[%c0_6, %c0_7] : memref<256x512xbf16, #tpu.memory_space<vmem>>, vector<256x512xbf16>
    %cst_8 = arith.constant dense<0.000000e+00> : vector<32x512xf32>
    %10 = tpu.matmul %8, %9, %cst_8 {dimension_numbers = #tpu.dot_dimension_numbers<[1], [0], [0], [1], [0, 0, 1, 1], [], []>} : vector<32x256xbf16>, vector<256x512xbf16>, vector<32x512xf32> -> vector<32x512xf32>
    %c0_9 = arith.constant 0 : index
    %c0_10 = arith.constant 0 : index
    %11 = vector.load %arg5[%c0_9, %c0_10] : memref<1x512xf32, #tpu.memory_space<vmem>>, vector<1x512xf32>
    %12 = vector.broadcast %11 : vector<1x512xf32> to vector<32x512xf32>
    %13 = arith.addf %10, %12 : vector<32x512xf32>
    %cst_11 = arith.constant 0.000000e+00 : f32
    %14 = vector.broadcast %cst_11 : f32 to vector<32x512xf32>
    %15 = arith.maximumf %13, %14 : vector<32x512xf32>
    %c0_12 = arith.constant 0 : index
    %c0_13 = arith.constant 0 : index
    %16 = vector.load %arg6[%c0_12, %c0_13] : memref<1x512xf32, #tpu.memory_space<vmem>>, vector<1x512xf32>
    %17 = vector.broadcast %16 : vector<1x512xf32> to vector<32x512xf32>
    %18 = arith.mulf %15, %17 : vector<32x512xf32>
    %19 = tpu.iota {dimensions = array<i32: 1>} : vector<32x128xi32>
    %c0_14 = arith.constant 0 : index
    %c0_15 = arith.constant 0 : index
    %20 = vector.load %arg7[%c0_14, %c0_15] : memref<1x128xf32, #tpu.memory_space<vmem>>, vector<1x128xf32>
    %21 = vector.shape_cast %20 : vector<1x128xf32> to vector<1x128xf32>
    %22 = vector.broadcast %21 : vector<1x128xf32> to vector<32x128xf32>
    %23 = vector.extract_strided_slice %18 {offsets = [0, 0], sizes = [32, 128], strides = [1, 1]} : vector<32x512xf32> to vector<32x128xf32>
    %cst_16 = arith.constant dense<0.000000e+00> : vector<32xf32>
    %24 = vector.multi_reduction <add>, %23, %cst_16 [1] : vector<32x128xf32> to vector<32xf32>
    %25 = vector.shape_cast %24 : vector<32xf32> to vector<32x1xf32>
    %c0_i32 = arith.constant 0 : i32
    %26 = vector.broadcast %c0_i32 : i32 to vector<32x128xi32>
    %27 = arith.cmpi eq, %19, %26 : vector<32x128xi32>
    %28 = vector.broadcast %25 : vector<32x1xf32> to vector<32x128xf32>
    %29 = arith.addf %22, %28 : vector<32x128xf32>
    %30 = arith.select %27, %29, %22 : vector<32x128xi1>, vector<32x128xf32>
    %31 = vector.extract_strided_slice %18 {offsets = [0, 128], sizes = [32, 128], strides = [1, 1]} : vector<32x512xf32> to vector<32x128xf32>
    %cst_17 = arith.constant dense<0.000000e+00> : vector<32xf32>
    %32 = vector.multi_reduction <add>, %31, %cst_17 [1] : vector<32x128xf32> to vector<32xf32>
    %33 = vector.shape_cast %32 : vector<32xf32> to vector<32x1xf32>
    %c1_i32 = arith.constant 1 : i32
    %34 = vector.broadcast %c1_i32 : i32 to vector<32x128xi32>
    %35 = arith.cmpi eq, %19, %34 : vector<32x128xi32>
    %36 = vector.broadcast %33 : vector<32x1xf32> to vector<32x128xf32>
    %37 = arith.addf %30, %36 : vector<32x128xf32>
    %38 = arith.select %35, %37, %30 : vector<32x128xi1>, vector<32x128xf32>
    %39 = vector.extract_strided_slice %18 {offsets = [0, 256], sizes = [32, 128], strides = [1, 1]} : vector<32x512xf32> to vector<32x128xf32>
    %cst_18 = arith.constant dense<0.000000e+00> : vector<32xf32>
    %40 = vector.multi_reduction <add>, %39, %cst_18 [1] : vector<32x128xf32> to vector<32xf32>
    %41 = vector.shape_cast %40 : vector<32xf32> to vector<32x1xf32>
    %c2_i32 = arith.constant 2 : i32
    %42 = vector.broadcast %c2_i32 : i32 to vector<32x128xi32>
    %43 = arith.cmpi eq, %19, %42 : vector<32x128xi32>
    %44 = vector.broadcast %41 : vector<32x1xf32> to vector<32x128xf32>
    %45 = arith.addf %38, %44 : vector<32x128xf32>
    %46 = arith.select %43, %45, %38 : vector<32x128xi1>, vector<32x128xf32>
    %47 = vector.extract_strided_slice %18 {offsets = [0, 384], sizes = [32, 128], strides = [1, 1]} : vector<32x512xf32> to vector<32x128xf32>
    %cst_19 = arith.constant dense<0.000000e+00> : vector<32xf32>
    %48 = vector.multi_reduction <add>, %47, %cst_19 [1] : vector<32x128xf32> to vector<32xf32>
    %49 = vector.shape_cast %48 : vector<32xf32> to vector<32x1xf32>
    %c3_i32 = arith.constant 3 : i32
    %50 = vector.broadcast %c3_i32 : i32 to vector<32x128xi32>
    %51 = arith.cmpi eq, %19, %50 : vector<32x128xi32>
    %52 = vector.broadcast %49 : vector<32x1xf32> to vector<32x128xf32>
    %53 = arith.addf %46, %52 : vector<32x128xf32>
    %54 = arith.select %51, %53, %46 : vector<32x128xi1>, vector<32x128xf32>
    %c0_20 = arith.constant 0 : index
    %c0_21 = arith.constant 0 : index
    %55 = vector.load %arg8[%c0_20, %c0_21] : memref<32x128xf32, #tpu.memory_space<vmem>>, vector<32x128xf32>
    tpu.vector_store %arg8[%c0_20, %c0_21], %54 {strides = array<i32>} : memref<32x128xf32, #tpu.memory_space<vmem>>, vector<32x128xf32>,
    return
  }
  func.func @transform_0(%arg0: i32) -> (i32, i32) {
    %c0_i32 = arith.constant 0 : i32
    %c0_i32_0 = arith.constant 0 : i32
    return %arg0, %c0_i32 : i32, i32
  }
  func.func @transform_1(%arg0: i32) -> (i32, i32) {
    %c0_i32 = arith.constant 0 : i32
    %c0_i32_0 = arith.constant 0 : i32
    %c0_i32_1 = arith.constant 0 : i32
    return %c0_i32, %c0_i32_0 : i32, i32
  }
  func.func @transform_2(%arg0: i32) -> (i32, i32) {
    %c0_i32 = arith.constant 0 : i32
    %c0_i32_0 = arith.constant 0 : i32
    %c0_i32_1 = arith.constant 0 : i32
    return %c0_i32, %c0_i32_0 : i32, i32
  }
  func.func @transform_3(%arg0: i32) -> (i32, i32) {
    %c0_i32 = arith.constant 0 : i32
    %c0_i32_0 = arith.constant 0 : i32
    %c0_i32_1 = arith.constant 0 : i32
    return %c0_i32, %c0_i32_0 : i32, i32
  }
  func.func @transform_4(%arg0: i32) -> (i32, i32) {
    %c0_i32 = arith.constant 0 : i32
    %c0_i32_0 = arith.constant 0 : i32
    %c0_i32_1 = arith.constant 0 : i32
    return %c0_i32, %c0_i32_0 : i32, i32
  }
  func.func @transform_5(%arg0: i32) -> (i32, i32) {
    %c0_i32 = arith.constant 0 : i32
    %c0_i32_0 = arith.constant 0 : i32
    %c0_i32_1 = arith.constant 0 : i32
    return %c0_i32, %c0_i32_0 : i32, i32
  }
  func.func @transform_6(%arg0: i32) -> (i32, i32) {
    %c0_i32 = arith.constant 0 : i32
    %c0_i32_0 = arith.constant 0 : i32
    %c0_i32_1 = arith.constant 0 : i32
    return %c0_i32, %c0_i32_0 : i32, i32
  }
  func.func @transform_7(%arg0: i32) -> (i32, i32) {
    %c0_i32 = arith.constant 0 : i32
    %c0_i32_0 = arith.constant 0 : i32
    return %arg0, %c0_i32 : i32, i32
  }
}

</mosaic_0001>

<bundles_post_ra>
// kernel: stsgcn_forward.1
= control target key start
LH: loop header
LB: loop body
LE: loop exit
PB: predicated region body
PF: predicated region fallthrough
CT: control target
= control target key end

     0   :  { %12 = vsyncpa [#allocation3], 0  ;;  %s1019_s24 = smov [#allocation2]   ;;  %s1142_s0 = inlined_call_operand.vmem [shape: bf16[32,24], index: 0, kind: input, shape index: {}]   ;;  %s1143_s1 = inlined_call_operand.vmem [shape: bf16[24,256], index: 1, kind: input, shape index: {}]   ;;  %s1144_s2 = inlined_call_operand.vmem [shape: f32[1,256], index: 2, kind: input, shape index: {}]   ;;  %s1145_s3 = inlined_call_operand.hbm [shape: bf16[256,512], index: 3, kind: input, shape index: {}]   ;;  %s1146_s4 = inlined_call_operand.vmem [shape: f32[1,512], index: 4, kind: input, shape index: {}]   ;;  %s1147_s5 = inlined_call_operand.vmem [shape: f32[1,512], index: 5, kind: input, shape index: {}]   ;;  %s1148_s6 = inlined_call_operand.vmem [shape: f32[1,128], index: 6, kind: input, shape index: {}]   ;;  %s1149_s7 = inlined_call_operand.vmem [shape: f32[32,128], index: 7, kind: output, shape index: {}]  }
   0x1   :  { %s24_s25 = sshll.u32 %s1019_s24, 4  ;;  %s25_s25 = int_to_ptr.vmem [resolvable:$true] %s24_s25 }
   0x2   :  { %s1005_s26 = scalar_lea.vmem %s25_s25, 8192  ;;  %p1010_p1 = scmp.lt.s32.totalorder %s25_s25, %s25_s25 }
   0x3   :  { %p1006_p0 = scmp.ne.s32.totalorder %s25_s25, %s1005_s26  ;;  %p1011_p2 = scmp.lt.s32.totalorder %s1005_s26, %s1005_s26 }
   0x5   :  { %p1012_p3 = por %p1011_p2, %p1010_p1 }
   0x7   :  { %p1013_p4 = pnand %p1012_p3, %p1006_p0 }
   0x9   :  { %1016 = shalt.err (!%p1013_p4)
}
   0xa   :  { %s1020_s27 = smov 256   ;;  %s1021_s28 = smov 16  }
   0xb   :  { %30 = dma.hbm_to_vmem [thread:$0]  %s1145_s3, 8192, %s25_s25, [#allocation3], %s1020_s27, %s1020_s27, %s1021_s28  }
   0xc   :  { %1017 = dma.done.wait [#allocation3], 8192  }
   0xd   :  { %1018 = vsyncadd [#allocation3], 4294959104  ;;  %v1022_v0 = vmov 0   ;;  %v47_v1 = vld [vmem:[%s1143_s1 + $0x10] sm:$0xff]  ;;  %vm92_vm0 = vcmask 1043456   ;;  %v899_v8 = vld [vmem:[%s1142_s0] sm:$0xff]  }
   0xe   :  { %131 = vmatprep.mubr.bf16.mxu0 %v1022_v0  ;;  %v821_v2 = vcombine.high %v47_v1, %v47_v1  ;;  %v820_v3 = vcombine.low %v47_v1, %v47_v1  ;;  %v896_v4 = vld [vmem:[%s1143_s1 + $0x4] ss:$8 sps:$4 sm:$0xff]   ;;  %v898_v6 = vld [vmem:[%s1143_s1] ss:$8 sps:$4 sm:$0xff]   ;;  %vm85_vm1 = vcmask 195584  }
   0xf   :  { %v901_v7 = vld [vmem:[#allocation2 + $0xe4] ss:$16 sps:$4 sm:$0xff]   ;;  %v905_v9 = vld [vmem:[#allocation2 + $0xec] ss:$16 sps:$4 sm:$0xff]   ;;  %v906_v10 = vld [vmem:[#allocation2 + $0xe0] ss:$16 sps:$4 sm:$0xff]  }
  0x10   :  { %822 = vmatprep.subr.msk.bf16.mxu0 %vm92_vm0, %v821_v2  ;;  %v94_v5 = vsel %vm92_vm0, %v820_v3, 0  ;;  %570 = vmatprep.subr.bf16.mxu1 %v901_v7  ;;  %v907_v11 = vld [vmem:[#allocation2 + $0xc4] ss:$16 sps:$4 sm:$0xff]   ;;  %v903_v12 = vld [vmem:[#allocation2 + $0xe8] ss:$16 sps:$4 sm:$0xff]  }
  0x11   :  { %112 = vmatpush1.bf16.msra.mxu0 %v94_v5  ;;  %571 = vmatpush1.bf16.msra.mxu1 %v906_v10  ;;  %v911_v13 = vld [vmem:[#allocation2 + $0xcc] ss:$16 sps:$4 sm:$0xff]   ;;  %v912_v14 = vld [vmem:[#allocation2 + $0xc0] ss:$16 sps:$4 sm:$0xff]   ;;  %v913_v15 = vld [vmem:[#allocation2 + $0xa4] ss:$16 sps:$4 sm:$0xff]  }
  0x12   :  { %113 = vmatprep.subr.bf16.mxu0 %v896_v4  ;;  %572 = vmatprep.subr.bf16.mxu1 %v907_v11  ;;  %v909_v16 = vld [vmem:[#allocation2 + $0xc8] ss:$16 sps:$4 sm:$0xff]   ;;  %v917_v17 = vld [vmem:[#allocation2 + $0xac] ss:$16 sps:$4 sm:$0xff]   ;;  %v918_v18 = vld [vmem:[#allocation2 + $0xa0] ss:$16 sps:$4 sm:$0xff]  }
  0x13   :  { %v919_v19 = vld [vmem:[#allocation2 + $0x84] ss:$16 sps:$4 sm:$0xff]   ;;  %v900_v20 = vld [vmem:[%s1142_s0 + $0x8] sm:$0xff]   ;;  %v924_v23 = vld [vmem:[#allocation2 + $0x80] ss:$16 sps:$4 sm:$0xff]  }
  0x14   :  { %v915_v21 = vld [vmem:[#allocation2 + $0xa8] ss:$16 sps:$4 sm:$0xff]   ;;  %v923_v22 = vld [vmem:[#allocation2 + $0x8c] ss:$16 sps:$4 sm:$0xff]   ;;  %v925_v24 = vld [vmem:[#allocation2 + $0x64] ss:$16 sps:$4 sm:$0xff]  }
  0x15   :  { %114 = vmatpush1.bf16.msra.mxu0 %v898_v6  ;;  %573 = vmatpush1.bf16.msra.mxu1 %v912_v14  ;;  %v921_v25 = vld [vmem:[#allocation2 + $0x88] ss:$16 sps:$4 sm:$0xff]   ;;  %v929_v26 = vld [vmem:[#allocation2 + $0x6c] ss:$16 sps:$4 sm:$0xff]   ;;  %v930_v27 = vld [vmem:[#allocation2 + $0x60] ss:$16 sps:$4 sm:$0xff]  }
  0x16   :  { %623 = vmatprep.subr.bf16.mxu0 %v905_v9  ;;  %574 = vmatprep.subr.bf16.mxu1 %v913_v15  ;;  %v931_v28 = vld [vmem:[#allocation2 + $0x44] ss:$16 sps:$4 sm:$0xff]   ;;  %v927_v29 = vld [vmem:[#allocation2 + $0x68] ss:$16 sps:$4 sm:$0xff]   ;;  %v935_v30 = vld [vmem:[#allocation2 + $0x4c] ss:$16 sps:$4 sm:$0xff]   ;;  %v50_v9 = vlaneseq }
  0x17   :  { %v936_v31 = vld [vmem:[#allocation2 + $0x40] ss:$16 sps:$4 sm:$0xff]   ;;  %v937_v32 = vld [vmem:[#allocation2 + $0x24] ss:$16 sps:$4 sm:$0xff]   ;;  %v933_v33 = vld [vmem:[#allocation2 + $0x48] ss:$16 sps:$4 sm:$0xff]  }
  0x18   :  { %823 = vmatmul.mubr.msk.bf16.vlgmr.msra.gmra.mxu0 %vm85_vm1, %v899_v8  ;;  %v941_v34 = vld [vmem:[#allocation2 + $0x2c] ss:$16 sps:$4 sm:$0xff]   ;;  %v942_v35 = vld [vmem:[#allocation2 + $0x20] ss:$16 sps:$4 sm:$0xff]   ;;  %v943_v36 = vld [vmem:[#allocation2 + $0x4] ss:$16 sps:$4 sm:$0xff]  }
  0x19   :  { %141 = vmatprep.mubr.bf16.mxu0 %v1022_v0  ;;  %624 = vmatpush1.bf16.msra.mxu0 %v903_v12  ;;  %v939_v37 = vld [vmem:[#allocation2 + $0x28] ss:$16 sps:$4 sm:$0xff]   ;;  %v947_v38 = vld [vmem:[#allocation2 + $0xc] ss:$16 sps:$4 sm:$0xff]   ;;  %v948_v39 = vld [vmem:[#allocation2] ss:$16 sps:$4 sm:$0xff]  }
  0x1a   :  { %625 = vmatprep.subr.bf16.mxu0 %v911_v13  ;;  %575 = vmatpush1.bf16.msra.mxu1 %v918_v18  ;;  %v949_v40 = vld [vmem:[#allocation2 + $0x1e4] ss:$16 sps:$4 sm:$0xff]   ;;  %v945_v41 = vld [vmem:[#allocation2 + $0x8] ss:$16 sps:$4 sm:$0xff]   ;;  %v953_v42 = vld [vmem:[#allocation2 + $0x1ec] ss:$16 sps:$4 sm:$0xff]  }
  0x1b   :  { %576 = vmatprep.subr.bf16.mxu1 %v919_v19  ;;  %v954_v43 = vld [vmem:[#allocation2 + $0x1e0] ss:$16 sps:$4 sm:$0xff]   ;;  %v951_v44 = vld [vmem:[#allocation2 + $0x1e8] ss:$16 sps:$4 sm:$0xff]   ;;  %v955_v45 = vld [vmem:[#allocation2 + $0x1c4] ss:$16 sps:$4 sm:$0xff]  }
  0x1c   :  { %v959_v46 = vld [vmem:[#allocation2 + $0x1cc] ss:$16 sps:$4 sm:$0xff]   ;;  %v960_v47 = vld [vmem:[#allocation2 + $0x1c0] ss:$16 sps:$4 sm:$0xff]   ;;  %v961_v48 = vld [vmem:[#allocation2 + $0x1a4] ss:$16 sps:$4 sm:$0xff]  }
  0x1d   :  { %626 = vmatpush1.bf16.msra.mxu0 %v909_v16  ;;  %v957_v49 = vld [vmem:[#allocation2 + $0x1c8] ss:$16 sps:$4 sm:$0xff]   ;;  %v965_v50 = vld [vmem:[#allocation2 + $0x1ac] ss:$16 sps:$4 sm:$0xff]   ;;  %v966_v51 = vld [vmem:[#allocation2 + $0x1a0] ss:$16 sps:$4 sm:$0xff]  }
  0x1e   :  { %627 = vmatprep.subr.bf16.mxu0 %v917_v17  ;;  %577 = vmatpush1.bf16.msra.mxu1 %v924_v23  ;;  %v967_v52 = vld [vmem:[#allocation2 + $0x184] ss:$16 sps:$4 sm:$0xff]   ;;  %v963_v53 = vld [vmem:[#allocation2 + $0x1a8] ss:$16 sps:$4 sm:$0xff]   ;;  %v971_v54 = vld [vmem:[#allocation2 + $0x18c] ss:$16 sps:$4 sm:$0xff]  }
  0x1f   :  { %578 = vmatprep.subr.bf16.mxu1 %v925_v24  ;;  %v972_v55 = vld [vmem:[#allocation2 + $0x180] ss:$16 sps:$4 sm:$0xff]   ;;  %v973_v56 = vld [vmem:[#allocation2 + $0x164] ss:$16 sps:$4 sm:$0xff]   ;;  %v969_v57 = vld [vmem:[#allocation2 + $0x188] ss:$16 sps:$4 sm:$0xff]  }
  0x20   :  { %824 = vmatmul.mubr.msk.bf16.gmra.mxu0 %vm85_vm1, %v900_v20  ;;  %v977_v58 = vld [vmem:[#allocation2 + $0x16c] ss:$16 sps:$4 sm:$0xff]   ;;  %v978_v59 = vld [vmem:[#allocation2 + $0x160] ss:$16 sps:$4 sm:$0xff]   ;;  %v975_v60 = vld [vmem:[#allocation2 + $0x168] ss:$16 sps:$4 sm:$0xff]  }
  0x21   :  { %628 = vmatpush1.bf16.msra.mxu0 %v915_v21  ;;  %v979_v61 = vld [vmem:[#allocation2 + $0x144] ss:$16 sps:$4 sm:$0xff]   ;;  %v983_v62 = vld [vmem:[#allocation2 + $0x14c] ss:$16 sps:$4 sm:$0xff]   ;;  %v981_v63 = vld [vmem:[#allocation2 + $0x148] ss:$16 sps:$4 sm:$0xff]  }
  0x22   :  { %629 = vmatprep.subr.bf16.mxu0 %v923_v22  ;;  %579 = vmatpush1.bf16.msra.mxu1 %v930_v27  ;;  %v984_v0 = vld [vmem:[#allocation2 + $0x140] ss:$16 sps:$4 sm:$0xff]   ;;  %v985_v1 = vld [vmem:[#allocation2 + $0x124] ss:$16 sps:$4 sm:$0xff]   ;;  %v989_v2 = vld [vmem:[#allocation2 + $0x12c] ss:$16 sps:$4 sm:$0xff]  }
  0x23   :  { %580 = vmatprep.subr.bf16.mxu1 %v931_v28  ;;  %v987_v3 = vld [vmem:[#allocation2 + $0x128] ss:$16 sps:$4 sm:$0xff]   ;;  %v990_v4 = vld [vmem:[#allocation2 + $0x120] ss:$16 sps:$4 sm:$0xff]   ;;  %v991_v5 = vld [vmem:[#allocation2 + $0x104] ss:$16 sps:$4 sm:$0xff]  }
  0x24   :  { %v995_v6 = vld [vmem:[#allocation2 + $0x10c] ss:$16 sps:$4 sm:$0xff]   ;;  %v993_v7 = vld [vmem:[#allocation2 + $0x108] ss:$16 sps:$4 sm:$0xff]   ;;  %v996_v8 = vld [vmem:[#allocation2 + $0x100] ss:$16 sps:$4 sm:$0xff]  }
  0x25   :  { %630 = vmatpush1.bf16.msra.mxu0 %v921_v25  ;;  %v1084_v10 = vshrl.u32 %v50_v9, 7  ;;  %v48_v13 = vld [vmem:[%s1144_s2] sm:$0x3] }
  0x26   :  { %631 = vmatprep.subr.bf16.mxu0 %v929_v26  ;;  %581 = vmatpush1.bf16.msra.mxu1 %v936_v31 }
  0x27   :  { %582 = vmatprep.subr.bf16.mxu1 %v937_v32  ;;  %v1087_v11 = vsub.s32 1, %v1084_v10  ;;  %v52_v12 = vsub.s32 0, %v1084_v10 }
  0x29   :  { %632 = vmatpush1.bf16.msra.mxu0 %v927_v29  ;;  %v57_v15 = vrot.slane %v48_v13, %v1087_v11  ;;  %v53_v16 = vrot.slane %v48_v13, %v52_v12 }
  0x2a   :  { %633 = vmatprep.subr.bf16.mxu0 %v935_v30  ;;  %583 = vmatpush1.bf16.msra.mxu1 %v942_v35 }
  0x2b   :  { %584 = vmatprep.subr.bf16.mxu1 %v943_v36 }
  0x2d   :  { %634 = vmatpush1.bf16.msra.mxu0 %v933_v33 }
  0x2e   :  { %635 = vmatprep.subr.bf16.mxu0 %v941_v34  ;;  %585 = vmatpush1.bf16.msra.mxu1 %v948_v39 }
  0x2f   :  { %586 = vmatprep.subr.bf16.mxu1 %v949_v40 }
  0x31   :  { %636 = vmatpush1.bf16.msra.mxu0 %v939_v37 }
  0x32   :  { %637 = vmatprep.subr.bf16.mxu0 %v947_v38  ;;  %587 = vmatpush2.bf16.msra.mxu1 %v954_v43 }
  0x33   :  { %588 = vmatprep.subr.bf16.mxu1 %v955_v45  ;;  %v240_v45 = vsub.s32 2, %v1084_v10 }
  0x35   :  { %638 = vmatpush1.bf16.msra.mxu0 %v945_v41 }
  0x36   :  { %639 = vmatprep.subr.bf16.mxu0 %v953_v42  ;;  %589 = vmatpush2.bf16.msra.mxu1 %v960_v47 }
  0x37   :  { %590 = vmatprep.subr.bf16.mxu1 %v961_v48  ;;  %v1101_v48 = vld [vmem:[%s1147_s5] sm:$0xf] }
  0x39   :  { %640 = vmatpush2.bf16.msra.mxu0 %v951_v44  ;;  %v228_v44 = vld [vmem:[%s1146_s4] sm:$0xf] }
  0x3a   :  { %641 = vmatprep.subr.bf16.mxu0 %v959_v46  ;;  %591 = vmatpush2.bf16.msra.mxu1 %v966_v51  ;;  %v233_v46 = vrot.slane %v228_v44, %v52_v12  ;;  %v241_v47 = vrot.slane %v228_v44, %v240_v45 }
  0x3b   :  { %592 = vmatprep.subr.bf16.mxu1 %v967_v52  ;;  %v237_v52 = vrot.slane %v228_v44, %v1087_v11 }
  0x3d   :  { %642 = vmatpush2.bf16.msra.mxu0 %v957_v49 }
  0x3e   :  { %643 = vmatprep.subr.bf16.mxu0 %v965_v50  ;;  %593 = vmatpush2.bf16.msra.mxu1 %v972_v55 }
  0x3f   :  { %594 = vmatprep.subr.bf16.mxu1 %v973_v56  ;;  %v697_v56 = vrot.slane %v1101_v48, %v52_v12  ;;  %v701_v12 = vrot.slane %v1101_v48, %v1087_v11 }
  0x41   :  { %644 = vmatpush2.bf16.msra.mxu0 %v963_v53 }
  0x42   :  { %645 = vmatprep.subr.bf16.mxu0 %v971_v54  ;;  %595 = vmatpush2.bf16.msra.mxu1 %v978_v59 }
  0x43   :  { %596 = vmatprep.subr.bf16.mxu1 %v979_v61 }
  0x45   :  { %646 = vmatpush2.bf16.msra.mxu0 %v969_v57 }
  0x46   :  { %647 = vmatprep.subr.bf16.mxu0 %v977_v58  ;;  %597 = vmatpush2.bf16.msra.mxu1 %v984_v0 }
  0x47   :  { %598 = vmatprep.subr.bf16.mxu1 %v985_v1 }
  0x49   :  { %648 = vmatpush2.bf16.msra.mxu0 %v975_v60 }
  0x4a   :  { %649 = vmatprep.subr.bf16.mxu0 %v983_v62  ;;  %599 = vmatpush2.bf16.msra.mxu1 %v990_v4 }
  0x4b   :  { %600 = vmatprep.subr.bf16.mxu1 %v991_v5 }
  0x4d   :  { %650 = vmatpush2.bf16.msra.mxu0 %v981_v63 }
  0x4e   :  { %651 = vmatprep.subr.bf16.mxu0 %v989_v2  ;;  %601 = vmatpush2.bf16.msra.mxu1 %v996_v8  ;;  %v705_v2 = vrot.slane %v1101_v48, %v240_v45 }
  0x51   :  { %652 = vmatpush2.bf16.msra.mxu0 %v987_v3 }
  0x52   :  { %653 = vmatprep.subr.bf16.mxu0 %v995_v6 }
  0x55   :  { %654 = vmatpush2.bf16.msra.mxu0 %v993_v7 }
  0xd8   :  { %v133_v14 = vpop.f32.mrf.mxu0 }
  0xd9   :  { %v134_v21 = vadd.f32 %v133_v14, %v53_v16 }
  0xda   :  { %v135_v17 = vpop.f32.mrf.mxu0 }
  0xdb   :  { %v136_v19 = vadd.f32 %v135_v17, %v57_v15  ;;  %v152_v28 = vmax.f32 %v134_v21, 0.0 }
  0xdc   :  { %v137_v18 = vpop.f32.mrf.mxu0 }
  0xdd   :  { %v138_v20 = vadd.f32 %v137_v18, %v53_v16  ;;  %v153_v26 = vmax.f32 %v136_v19, 0.0 }
  0xde   :  { %v139_v22 = vpop.f32.mrf.mxu0 }
  0xdf   :  { %v140_v23 = vadd.f32 %v139_v22, %v57_v15  ;;  %v154_v24 = vmax.f32 %v138_v20, 0.0  ;;  %v244_v20 = vsub.s32 3, %v1084_v10 }
  0xe0   :  { %v143_v25 = vpop.f32.mrf.mxu0 }
  0xe1   :  { %v155_v27 = vmax.f32 %v140_v23, 0.0  ;;  %v160_v31 = vpack.c.bf16 %v154_v24, %v152_v28  ;;  %v144_v32 = vadd.f32 %v143_v25, %v53_v16  ;;  %v245_v11 = vrot.slane %v228_v44, %v244_v20 }
  0xe2   :  { %v145_v29 = vpop.f32.mrf.mxu0 }
  0xe3   :  { %v161_v30 = vpack.c.bf16 %v155_v27, %v153_v26  ;;  %v146_v34 = vadd.f32 %v145_v29, %v57_v15  ;;  %v156_v38 = vmax.f32 %v144_v32, 0.0 }
  0xe4   :  { %v147_v33 = vpop.f32.mrf.mxu0 }
  0xe5   :  { %v148_v35 = vadd.f32 %v147_v33, %v53_v16  ;;  %602 = vmatprep.mubr.bf16.mxu1 %v161_v30  ;;  %655 = vmatprep.mubr.bf16.mxu0 %v161_v30  ;;  %v157_v40 = vmax.f32 %v146_v34, 0.0 }
  0xe6   :  { %v149_v36 = vpop.f32.mrf.mxu0  ;;  %603 = vmatmul.mubr.bf16.vlgmr.msra.gmra.mxu1 %v160_v31  ;;  %656 = vmatmul.mubr.bf16.vlgmr.msra.gmra.mxu0 %v160_v31 }
  0xe7   :  { %v150_v37 = vadd.f32 %v149_v36, %v57_v15  ;;  %v158_v39 = vmax.f32 %v148_v35, 0.0 }
  0xe9   :  { %v159_v41 = vmax.f32 %v150_v37, 0.0  ;;  %v162_v43 = vpack.c.bf16 %v158_v39, %v156_v38 }
  0xeb   :  { %v163_v42 = vpack.c.bf16 %v159_v41, %v157_v40 }
  0xed   :  { %612 = vmatprep.mubr.bf16.mxu1 %v163_v42  ;;  %665 = vmatprep.mubr.bf16.mxu0 %v163_v42  ;;  %v709_v42 = vrot.slane %v1101_v48, %v244_v20 }
  0xee   :  { %613 = vmatmul.mubr.bf16.gmra.mxu1 %v162_v43  ;;  %666 = vmatmul.mubr.bf16.gmra.mxu0 %v162_v43 }
 0x1a6   :  { %v604_v49 = vpop.f32.mrf.mxu1  ;;  %v657_v50 = vpop.f32.mrf.mxu0 }
 0x1a7   :  { %v605_v51 = vadd.f32 %v604_v49, %v233_v46  ;;  %v658_v53 = vadd.f32 %v657_v50, %v241_v47 }
 0x1a8   :  { %v606_v54 = vpop.f32.mrf.mxu1  ;;  %v659_v55 = vpop.f32.mrf.mxu0 }
 0x1a9   :  { %v676_v57 = vmax.f32 %v605_v51, 0.0  ;;  %v607_v60 = vadd.f32 %v606_v54, %v237_v52  ;;  %v678_v62 = vmax.f32 %v658_v53, 0.0  ;;  %v660_v10 = vadd.f32 %v659_v55, %v245_v11 }
 0x1aa   :  { %v608_v58 = vpop.f32.mrf.mxu1  ;;  %v661_v59 = vpop.f32.mrf.mxu0 }
 0x1ab   :  { %v662_v61 = vadd.f32 %v661_v59, %v241_v47  ;;  %v714_v1 = vmul.f32 %v697_v56, %v676_v57  ;;  %v677_v7 = vmax.f32 %v607_v60, 0.0  ;;  %v609_v8 = vadd.f32 %v608_v58, %v233_v46  ;;  %v889_v60 = vld [vmem:[%s1148_s6] ss:$0 sm:$0xff] }
 0x1ac   :  { %v610_v63 = vpop.f32.mrf.mxu1  ;;  %v663_v0 = vpop.f32.mrf.mxu0  ;;  %v716_v17 = vmul.f32 %v705_v2, %v678_v62  ;;  %v679_v40 = vmax.f32 %v660_v10, 0.0 }
 0x1ad   :  { %v682_v3 = vmax.f32 %v662_v61, 0.0  ;;  %v611_v4 = vadd.f32 %v610_v63, %v237_v52  ;;  %739 = vadd.xlane.f32.xlu0 %v714_v1  ;;  %v680_v21 = vmax.f32 %v609_v8, 0.0  ;;  %v715_v22 = vmul.f32 %v701_v12, %v677_v7 }
 0x1ae   :  { %v614_v5 = vpop.f32.mrf.mxu1  ;;  %v667_v6 = vpop.f32.mrf.mxu0  ;;  %v664_v41 = vadd.f32 %v663_v0, %v245_v11  ;;  %v717_v49 = vmul.f32 %v709_v42, %v679_v40  ;;  %v731_v61 = vand.u32 127, %v50_v9 }
 0x1af   :  { %v681_v13 = vmax.f32 %v611_v4, 0.0  ;;  %v615_v14 = vadd.f32 %v614_v5, %v233_v46  ;;  %v720_v16 = vmul.f32 %v705_v2, %v682_v3  ;;  %v668_v24 = vadd.f32 %v667_v6, %v241_v47 }
 0x1b0   :  { %v616_v15 = vpop.f32.mrf.mxu1  ;;  %v669_v18 = vpop.f32.mrf.mxu0  ;;  %v718_v29 = vmul.f32 %v697_v56, %v680_v21  ;;  %v683_v50 = vmax.f32 %v664_v41, 0.0  ;;  %vm747_vm2 = vcmp.eq.s32.totalorder %v731_v61, 0  ;;  %vm764_vm3 = vcmp.eq.s32.totalorder %v731_v61, 1 }
 0x1b1   :  { %775 = vadd.xlane.f32.xlu1 %v720_v16  ;;  %773 = vadd.xlane.f32.xlu0 %v716_v17  ;;  %v684_v23 = vmax.f32 %v615_v14, 0.0  ;;  %v719_v26 = vmul.f32 %v701_v12, %v681_v13  ;;  %v617_v28 = vadd.f32 %v616_v15, %v237_v52  ;;  %v686_v30 = vmax.f32 %v668_v24, 0.0 }
 0x1b2   :  { %v618_v19 = vpop.f32.mrf.mxu1  ;;  %v671_v27 = vpop.f32.mrf.mxu0  ;;  %v670_v43 = vadd.f32 %v669_v18, %v245_v11  ;;  %v721_v55 = vmul.f32 %v709_v42, %v683_v50  ;;  %vm781_vm4 = vcmp.eq.s32.totalorder %v731_v61, 2  ;;  %vm798_vm5 = vcmp.eq.s32.totalorder %v731_v61, 3 }
 0x1b3   :  { %v619_v25 = vadd.f32 %v618_v19, %v233_v46  ;;  %v672_v32 = vadd.f32 %v671_v27, %v241_v47  ;;  %v722_v33 = vmul.f32 %v697_v56, %v684_v23  ;;  %v685_v35 = vmax.f32 %v617_v28, 0.0 }
 0x1b4   :  { %v620_v34 = vpop.f32.mrf.mxu1  ;;  %v724_v39 = vmul.f32 %v705_v2, %v686_v30  ;;  %v673_v47 = vpop.f32.mrf.mxu0  ;;  %v687_v51 = vmax.f32 %v670_v43, 0.0 }
 0x1b5   :  { %758 = vadd.xlane.f32.xlu1 %v719_v26  ;;  %756 = vadd.xlane.f32.xlu0 %v715_v22  ;;  %v688_v31 = vmax.f32 %v619_v25, 0.0  ;;  %v690_v36 = vmax.f32 %v672_v32, 0.0  ;;  %v621_v37 = vadd.f32 %v620_v34, %v237_v52  ;;  %v723_v46 = vmul.f32 %v701_v12, %v685_v35 }
 0x1b6   :  { %v674_v53 = vadd.f32 %v673_v47, %v245_v11 }
 0x1b7   :  { %v726_v38 = vmul.f32 %v697_v56, %v688_v31  ;;  %v689_v44 = vmax.f32 %v621_v37, 0.0  ;;  %v728_v45 = vmul.f32 %v705_v2, %v690_v36  ;;  %v725_v56 = vmul.f32 %v709_v42, %v687_v51 }
 0x1b8   :  { %v691_v54 = vmax.f32 %v674_v53, 0.0 }
 0x1b9   :  { %743 = vadd.xlane.f32.xlu1 %v722_v33  ;;  %741 = vadd.xlane.f32.xlu0 %v718_v29  ;;  %v727_v52 = vmul.f32 %v701_v12, %v689_v44 }
 0x1ba   :  { %v729_v48 = vmul.f32 %v709_v42, %v691_v54 }
 0x1bd   :  { %745 = vadd.xlane.f32.xlu1 %v726_v38  ;;  %777 = vadd.xlane.f32.xlu0 %v724_v39 }
 0x1c1   :  { %779 = vadd.xlane.f32.xlu1 %v728_v45  ;;  %760 = vadd.xlane.f32.xlu0 %v723_v46 }
 0x1c5   :  { %762 = vadd.xlane.f32.xlu1 %v727_v52  ;;  %790 = vadd.xlane.f32.xlu0 %v717_v49 }
 0x1c9   :  { %792 = vadd.xlane.f32.xlu1 %v721_v55  ;;  %794 = vadd.xlane.f32.xlu0 %v725_v56 }
 0x1cd   :  { %796 = vadd.xlane.f32.xlu1 %v729_v48 }
 0x236   :  { %v740_v57 = vpop.xlane.xlu0 %739 }
 0x237   :  { %v748_v62 = vadd.f32 %v889_v60, %v740_v57 }
 0x239   :  { %v752_v1 = vsel %vm747_vm2, %v748_v62, %v889_v60 }
 0x23a   :  { %v776_v58 = vpop.xlane.xlu1 %775  ;;  %v774_v59 = vpop.xlane.xlu0 %773 }
 0x23e   :  { %v759_v63 = vpop.xlane.xlu1 %758  ;;  %v757_v0 = vpop.xlane.xlu0 %756 }
 0x23f   :  { %v765_v4 = vadd.f32 %v757_v0, %v752_v1 }
 0x241   :  { %v769_v14 = vsel %vm764_vm3, %v765_v4, %v752_v1 }
 0x242   :  { %v744_v2 = vpop.xlane.xlu1 %743  ;;  %v742_v3 = vpop.xlane.xlu0 %741  ;;  %v782_v18 = vadd.f32 %v774_v59, %v769_v14 }
 0x243   :  { %v749_v5 = vadd.f32 %v889_v60, %v742_v3  ;;  %v750_v7 = vadd.f32 %v889_v60, %v744_v2 }
 0x244   :  { %v786_v24 = vsel %vm781_vm4, %v782_v18, %v769_v14 }
 0x245   :  { %v753_v6 = vsel %vm747_vm2, %v749_v5, %v889_v60  ;;  %v754_v16 = vsel %vm747_vm2, %v750_v7, %v889_v60 }
 0x246   :  { %v746_v8 = vpop.xlane.xlu1 %745  ;;  %v778_v12 = vpop.xlane.xlu0 %777  ;;  %v766_v13 = vadd.f32 %v759_v63, %v753_v6 }
 0x247   :  { %v751_v9 = vadd.f32 %v889_v60, %v746_v8 }
 0x248   :  { %v770_v20 = vsel %vm764_vm3, %v766_v13, %v753_v6 }
 0x249   :  { %v755_v22 = vsel %vm747_vm2, %v751_v9, %v889_v60  ;;  %v783_v26 = vadd.f32 %v776_v58, %v770_v20 }
 0x24a   :  { %v780_v15 = vpop.xlane.xlu1 %779  ;;  %v761_v17 = vpop.xlane.xlu0 %760 }
 0x24b   :  { %v767_v19 = vadd.f32 %v761_v17, %v754_v16  ;;  %v787_v32 = vsel %vm781_vm4, %v783_v26, %v770_v20 }
 0x24d   :  { %v771_v21 = vsel %vm764_vm3, %v767_v19, %v754_v16 }
 0x24e   :  { %v763_v23 = vpop.xlane.xlu1 %762  ;;  %v791_v25 = vpop.xlane.xlu0 %790  ;;  %v784_v27 = vadd.f32 %v778_v12, %v771_v21 }
 0x24f   :  { %v768_v11 = vadd.f32 %v763_v23, %v755_v22  ;;  %v799_v28 = vadd.f32 %v791_v25, %v786_v24 }
 0x250   :  { %v788_v33 = vsel %vm781_vm4, %v784_v27, %v771_v21 }
 0x251   :  { %v803_v29 = vsel %vm798_vm5, %v799_v28, %v786_v24  ;;  %v772_v30 = vsel %vm764_vm3, %v768_v11, %v755_v22 }
 0x252   :  { %807 = vst [vmem:[%s1149_s7] sm:$0xff] %v803_v29  ;;  %v793_v31 = vpop.xlane.xlu1 %792  ;;  %v795_v34 = vpop.xlane.xlu0 %794  ;;  %v785_v10 = vadd.f32 %v780_v15, %v772_v30 }
 0x253   :  { %v800_v35 = vadd.f32 %v793_v31, %v787_v32  ;;  %v801_v36 = vadd.f32 %v795_v34, %v788_v33 }
 0x254   :  { %v789_v39 = vsel %vm781_vm4, %v785_v10, %v772_v30 }
 0x255   :  { %v804_v37 = vsel %vm798_vm5, %v800_v35, %v787_v32  ;;  %v805_v38 = vsel %vm798_vm5, %v801_v36, %v788_v33 }
 0x256   :  { %808 = vst [vmem:[%s1149_s7 + $0x8] sm:$0xff] %v804_v37  ;;  %809 = vst [vmem:[%s1149_s7 + $0x10] sm:$0xff] %v805_v38  ;;  %v797_v40 = vpop.xlane.xlu1 %796 }
 0x257   :  { %v802_v41 = vadd.f32 %v797_v40, %v789_v39 }
 0x259   :  { %v806_v42 = vsel %vm798_vm5, %v802_v41, %v789_v39 }
 0x25a   :  { %810 = vst [vmem:[%s1149_s7 + $0x18] sm:$0xff] %v806_v42 }
 0x25b   :  { %815 = vsyncpa [#allocation3], 1 }

</bundles_post_ra>
